<compile_context>
chip_gen: v7x
topology: tpu7x:2x2x1
jax: 0.10.0
libtpu: 0.0.40
codegen_flags: <defaults>
</compile_context>

<pallas_src>
import functools

import jax
import jax.numpy as jnp
from jax.experimental import pallas as pl
from jax.experimental.pallas import tpu as pltpu

NEG_SLOPE = 0.2
MASK_FILL = -1e30
LANE = 128
TM_MAX = 256        # row-tile upper bound (tile-size sweep sweet spot)


def _round_up(v, m):
    return (v + m - 1) // m * m


def _pad_to(a, shape):
    return jnp.pad(a, [(0, s - d) for d, s in zip(a.shape, shape)])


def _vmem_limit_bytes():
    # Generation-aware VMEM budget: ~75% of physical (v5e/v6e: 96 MiB,
    # v7x: 48 MiB).  Falls back to the conservative 48 MiB if the query fails.
    try:
        cap = int(pltpu.get_tpu_info().vmem_capacity_bytes)
    except Exception:
        cap = 64 * 1024 * 1024
    return min(cap * 3 // 4, 112 * 1024 * 1024)


# --------------------------- kernels ---------------------------------------

def _proj_kernel(x_ref, w_ref, h_ref):
    """h = x @ W  (bf16 inputs, f32 MXU accumulate, bf16 output)."""
    h_ref[...] = jnp.dot(x_ref[...], w_ref[...],
                         preferred_element_type=jnp.float32).astype(jnp.bfloat16)


def _attn_kernel(adj_ref, h_ref, a_src_ref, att_dst_ref, bias_ref, o_ref,
                 *, tm, apply_relu):
    """One TM-row tile of masked-softmax attention + aggregation (+ optional relu).

    VALU-slot bound on the [TM, NPAD] slab, so the per-element chain is kept
    short: add, max-based leaky_relu, one mask select, sub-max, exp.  Softmax
    normalization is deferred to the [TM, DPAD] accumulator after the MXU
    matmul (EUP reciprocal, DPAD-wide multiply instead of NPAD-wide).
    """
    row_off = pl.multiple_of(pl.program_id(0) * tm, tm)

    # Per-target attention scalar for this row tile, from the VMEM-resident h
    # (no [N,1] HBM intermediate).  D-wide multiply + XLU reduce; negligible vs
    # the NPAD-wide slab below.
    h_tile = h_ref[pl.ds(row_off, tm), :]                            # [TM, DPAD] bf16
    a_dst = jnp.sum(h_tile.astype(jnp.float32) * att_dst_ref[...],
                    axis=-1, keepdims=True)                          # [TM, 1] f32

    logits = a_dst + a_src_ref[...]                                  # [TM,1]+[1,NPAD]
    logits = jnp.maximum(logits, NEG_SLOPE * logits)                 # leaky_relu(0.2)
    logits = jnp.where(adj_ref[...] != 0, logits, MASK_FILL)         # mask non-edges
    m = jnp.max(logits, axis=-1, keepdims=True)
    # Unnormalized softmax numerator.  Masked entries are (MASK_FILL - m) and
    # underflow to exactly 0; real rows always contain their own self loop so
    # the max term contributes exp(0) = 1 and denom >= 1 (padded rows give a
    # finite all-ones row that is sliced off / masked downstream).
    p = jnp.exp(logits - m)                                          # [TM, NPAD]
    denom = jnp.sum(p, axis=-1, keepdims=True)                       # [TM, 1]

    acc = jnp.dot(p.astype(jnp.bfloat16), h_ref[...],
                  preferred_element_type=jnp.float32)                # [TM, DPAD]
    out = acc * pl.reciprocal(denom, approx=True) + bias_ref[...]    # deferred norm
    if apply_relu:
        out = jnp.maximum(out, 0.0)
    o_ref[...] = out.astype(o_ref.dtype)


# --------------------------- layer wrapper ---------------------------------

def _gat_layer(x_bf16, adj_i8, w_bf16, att_src_col, att_dst_row, bias,
               *, apply_relu, tm, out_dtype, vmem_limit):
    npad, fpad = x_bf16.shape
    dpad = w_bf16.shape[1]
    grid = (npad // tm,)
    cparams = pltpu.CompilerParams(
        dimension_semantics=("parallel",),
        vmem_limit_bytes=vmem_limit)

    # --- projection: h = x @ W (rows tiled, W resident) ---
    h = pl.pallas_call(
        _proj_kernel,
        out_shape=jax.ShapeDtypeStruct((npad, dpad), jnp.bfloat16),
        grid=grid,
        in_specs=[pl.BlockSpec((tm, fpad), lambda i: (i, 0)),        # x rows
                  pl.BlockSpec((fpad, dpad), lambda i: (0, 0))],     # W (resident)
        out_specs=pl.BlockSpec((tm, dpad), lambda i: (i, 0)),
        compiler_params=cparams,
    )(x_bf16, w_bf16)

    # Lane-dense [1, NPAD] per-source attention row, computed once per layer by
    # a tiny O(N*D) XLA matmul (cheaper in HBM traffic than writing a
    # lane-padded [N,1] intermediate from the kernel and relaying it out).
    a_src_row = (h.astype(jnp.float32) @ att_src_col).T              # [1, NPAD] f32

    # --- attention + aggregation (row-tiled over target nodes) ---
    # The index_map==(0,0) inputs (h, a_src, att_dst, bias) are grid-invariant
    # and only DMA'd once.  TODO(synk): single-buffer the resident inputs
    # (pl.Buffered(1)) and add a column-tiled online-softmax / CSR path once
    # resident h + [TM, NPAD] adj tiles outgrow VMEM on large graphs (v7x).
    out = pl.pallas_call(
        functools.partial(_attn_kernel, tm=tm, apply_relu=apply_relu),
        out_shape=jax.ShapeDtypeStruct((npad, dpad), out_dtype),
        grid=grid,
        in_specs=[pl.BlockSpec((tm, npad), lambda i: (i, 0)),        # adj int8 rows
                  pl.BlockSpec((npad, dpad), lambda i: (0, 0)),      # h bf16 (resident)
                  pl.BlockSpec((1, npad), lambda i: (0, 0)),         # a_src row
                  pl.BlockSpec((1, dpad), lambda i: (0, 0)),         # att_dst row
                  pl.BlockSpec((1, dpad), lambda i: (0, 0))],        # bias
        out_specs=pl.BlockSpec((tm, dpad), lambda i: (i, 0)),
        compiler_params=cparams,
    )(adj_i8, h, a_src_row, att_dst_row, bias)
    return out


# --------------------------- model wrapper ----------------------------------

def build_dense_adj(edge_index, num_nodes, num_nodes_padded):
    """int8 adj[i, j] = 1 iff edge j -> i (edge_index[0]=src, [1]=dst), + self loops."""
    src, dst = edge_index[0], edge_index[1]
    adj = jnp.zeros((num_nodes_padded, num_nodes_padded), jnp.int8)
    adj = adj.at[dst, src].set(1)
    diag = jnp.arange(num_nodes)
    adj = adj.at[diag, diag].set(1)                                  # add_self_loops=True
    return adj


def gat_forward(x, edge_index, params):
    N, F = x.shape
    H = params["w1"].shape[1]
    C = params["w2"].shape[1]

    # Row tile: multiple of 32 (int8 adjacency sublane tiling) and chosen so
    # the row grid has >= 2 steps whenever N > 32, letting both v7x
    # TensorCores work under dimension_semantics=("parallel",).
    n32 = _round_up(N, 32)
    tm = min(TM_MAX, _round_up(-(-n32 // 2), 32))
    npad = _round_up(N, tm)
    fpad = _round_up(F, LANE)
    dpad1 = _round_up(H, LANE)
    dpad2 = _round_up(C, LANE)
    vmem_limit = _vmem_limit_bytes()

    adj = build_dense_adj(edge_index, N, npad)

    # Pad everything lane-dense; padded rows/lanes are zero.  x and W travel as
    # bf16 (MXU inputs); attention vectors and biases stay f32.
    x_p = _pad_to(x, (npad, fpad)).astype(jnp.bfloat16)
    w1 = _pad_to(params["w1"], (fpad, dpad1)).astype(jnp.bfloat16)
    as1 = _pad_to(params["att_src1"], (1, dpad1)).T                  # [dpad1, 1] f32
    ad1 = _pad_to(params["att_dst1"], (1, dpad1))                    # [1, dpad1] f32
    b1 = _pad_to(params["b1"], (1, dpad1))
    w2 = _pad_to(params["w2"], (dpad1, dpad2)).astype(jnp.bfloat16)
    as2 = _pad_to(params["att_src2"], (1, dpad2)).T
    ad2 = _pad_to(params["att_dst2"], (1, dpad2))
    b2 = _pad_to(params["b2"], (1, dpad2))

    # Layer 1 (relu fused into the attention kernel); inter-layer activation in
    # bf16 to halve HBM traffic.
    x1 = _gat_layer(x_p, adj, w1, as1, ad1, b1, apply_relu=True, tm=tm,
                    out_dtype=jnp.bfloat16, vmem_limit=vmem_limit)
    # F.dropout(p=0.5, training=self.training): eval mode => identity.
    # TODO(synk): training-mode stochastic dropout (pltpu PRNG) not implemented.
    x2 = _gat_layer(x1, adj, w2, as2, ad2, b2, apply_relu=False, tm=tm,
                    out_dtype=jnp.float32, vmem_limit=vmem_limit)
    return x2[:N, :C]


# --------------------------- params / reference -----------------------------

def init_params(key, num_features, hidden_channels, num_classes):
    ks = jax.random.split(key, 8)

    def glorot(k, shape):
        fan_in, fan_out = shape[0], shape[-1]
        scale = jnp.sqrt(6.0 / (fan_in + fan_out))
        return jax.random.uniform(k, shape, jnp.float32, -scale, scale)

    return {
        "w1": glorot(ks[0], (num_features, hidden_channels)),
        "att_src1": glorot(ks[1], (1, hidden_channels)),
        "att_dst1": glorot(ks[2], (1, hidden_channels)),
        "b1": jnp.zeros((1, hidden_channels), jnp.float32),
        "w2": glorot(ks[3], (hidden_channels, num_classes)),
        "att_src2": glorot(ks[4], (1, num_classes)),
        "att_dst2": glorot(ks[5], (1, num_classes)),
        "b2": jnp.zeros((1, num_classes), jnp.float32),
    }


def _gat_conv_ref(x, adj_f32, w, att_src, att_dst, bias):
    h = x @ w
    a_src = jnp.sum(h * att_src, axis=-1, keepdims=True)
    a_dst = jnp.sum(h * att_dst, axis=-1, keepdims=True)
    logits = a_dst + a_src.T
    logits = jnp.where(logits > 0, logits, NEG_SLOPE * logits)
    logits = jnp.where(adj_f32 > 0, logits, MASK_FILL)
    p = jnp.exp(logits - logits.max(-1, keepdims=True)) * adj_f32
    attn = p / p.sum(-1, keepdims=True)
    return attn @ h + bias


def gat_ref(x, edge_index, params):
    N = x.shape[0]
    adj = build_dense_adj(edge_index, N, N).astype(jnp.float32)
    h1 = _gat_conv_ref(x, adj, params["w1"], params["att_src1"],
                       params["att_dst1"], params["b1"])
    h1 = jnp.maximum(h1, 0.0)
    return _gat_conv_ref(h1, adj, params["w2"], params["att_src2"],
                         params["att_dst2"], params["b2"])


# --------------------------- main -------------------------------------------

if __name__ == "__main__":
    N = 64            # nodes
    F = 16            # dataset.num_features
    H = 32            # hidden_channels
    C = 8             # dataset.num_classes
    E = 256           # edges

    key = jax.random.PRNGKey(0)
    kx, ke1, ke2, kp = jax.random.split(key, 4)

    x = jax.random.normal(kx, (N, F), jnp.float32)
    src = jax.random.randint(ke1, (E,), 0, N)
    dst = jax.random.randint(ke2, (E,), 0, N)
    edge_index = jnp.stack([src, dst], axis=0)            # [2, E], PyG convention

    params = init_params(kp, F, H, C)

    out = jax.jit(gat_forward)(x, edge_index, params)
    jax.block_until_ready(out)
    assert out.shape == (N, C)
    assert bool(jnp.all(jnp.isfinite(out)))

    ref = gat_ref(x, edge_index, params)
    max_err = float(jnp.max(jnp.abs(out - ref)))
    assert max_err < 0.1, f"max abs err vs f32 reference: {max_err}"
    print("KERNEL_OK")
</pallas_src>

<mosaic_0001>
module attributes {stable_mosaic.version = 11 : i64} {
  func.func @_proj_kernel(%arg0: i32, %arg1: memref<32x128xbf16, #tpu.memory_space<vmem>>, %arg2: memref<128x128xbf16, #tpu.memory_space<vmem>>, %arg3: memref<32x128xbf16, #tpu.memory_space<vmem>>) attributes {dimension_semantics = [#tpu.dimension_semantics<parallel>], iteration_bounds = array<i64: 2>, scalar_prefetch = 0 : i64, scratch_operands = 0 : i64, tpu.core_type = #tpu.core_type<tc>, window_params = [{transform_indices = @transform_0, window_bounds = array<i64: 32, 128>}, {pipeline_mode = #tpu.pipeline_mode<synchronous>, transform_indices = @transform_1, window_bounds = array<i64: 128, 128>}, {transform_indices = @transform_2, window_bounds = array<i64: 32, 128>}]} {
    %c0 = arith.constant 0 : index
    %c0_0 = arith.constant 0 : index
    %0 = vector.load %arg1[%c0, %c0_0] : memref<32x128xbf16, #tpu.memory_space<vmem>>, vector<32x128xbf16>
    %c0_1 = arith.constant 0 : index
    %c0_2 = arith.constant 0 : index
    %1 = vector.load %arg2[%c0_1, %c0_2] : memref<128x128xbf16, #tpu.memory_space<vmem>>, vector<128x128xbf16>
    %cst = arith.constant dense<0.000000e+00> : vector<32x128xf32>
    %2 = tpu.matmul %0, %1, %cst {dimension_numbers = #tpu.dot_dimension_numbers<[1], [0], [0], [1], [0, 0, 1, 1], [], []>} : vector<32x128xbf16>, vector<128x128xbf16>, vector<32x128xf32> -> vector<32x128xf32>
    %3 = arith.truncf %2 : vector<32x128xf32> to vector<32x128xbf16>
    %c0_3 = arith.constant 0 : index
    %c0_4 = arith.constant 0 : index
    %4 = vector.load %arg3[%c0_3, %c0_4] : memref<32x128xbf16, #tpu.memory_space<vmem>>, vector<32x128xbf16>
    tpu.vector_store %arg3[%c0_3, %c0_4], %3 {strides = array<i32>} : memref<32x128xbf16, #tpu.memory_space<vmem>>, vector<32x128xbf16>,
    return
  }
  func.func @transform_0(%arg0: i32) -> (i32, i32) {
    %c0_i32 = arith.constant 0 : i32
    %c0_i32_0 = arith.constant 0 : i32
    return %arg0, %c0_i32 : i32, i32
  }
  func.func @transform_1(%arg0: i32) -> (i32, i32) {
    %c0_i32 = arith.constant 0 : i32
    %c0_i32_0 = arith.constant 0 : i32
    %c0_i32_1 = arith.constant 0 : i32
    return %c0_i32, %c0_i32_0 : i32, i32
  }
  func.func @transform_2(%arg0: i32) -> (i32, i32) {
    %c0_i32 = arith.constant 0 : i32
    %c0_i32_0 = arith.constant 0 : i32
    return %arg0, %c0_i32 : i32, i32
  }
}

module attributes {stable_mosaic.version = 11 : i64} {
  func.func @_attn_kernel(%arg0: i32, %arg1: memref<32x64xi8, #tpu.memory_space<vmem>>, %arg2: memref<64x128xbf16, #tpu.memory_space<vmem>>, %arg3: memref<1x64xf32, #tpu.memory_space<vmem>>, %arg4: memref<1x128xf32, #tpu.memory_space<vmem>>, %arg5: memref<1x128xf32, #tpu.memory_space<vmem>>, %arg6: memref<32x128xbf16, #tpu.memory_space<vmem>>) attributes {dimension_semantics = [#tpu.dimension_semantics<parallel>], iteration_bounds = array<i64: 2>, scalar_prefetch = 0 : i64, scratch_operands = 0 : i64, tpu.core_type = #tpu.core_type<tc>, window_params = [{transform_indices = @transform_0, window_bounds = array<i64: 32, 64>}, {pipeline_mode = #tpu.pipeline_mode<synchronous>, transform_indices = @transform_1, window_bounds = array<i64: 64, 128>}, {pipeline_mode = #tpu.pipeline_mode<synchronous>, transform_indices = @transform_2, window_bounds = array<i64: 1, 64>}, {pipeline_mode = #tpu.pipeline_mode<synchronous>, transform_indices = @transform_3, window_bounds = array<i64: 1, 128>}, {pipeline_mode = #tpu.pipeline_mode<synchronous>, transform_indices = @transform_4, window_bounds = array<i64: 1, 128>}, {transform_indices = @transform_5, window_bounds = array<i64: 32, 128>}]} {
    %c32_i32 = arith.constant 32 : i32
    %0 = arith.muli %arg0, %c32_i32 : i32
    %1 = tpu.assume_multiple %0, 32 : i32
    %2 = arith.index_cast %1 : i32 to index
    %c0 = arith.constant 0 : index
    %3 = vector.load %arg2[%2, %c0] : memref<64x128xbf16, #tpu.memory_space<vmem>>, vector<32x128xbf16>
    %4 = arith.extf %3 : vector<32x128xbf16> to vector<32x128xf32>
    %c0_0 = arith.constant 0 : index
    %c0_1 = arith.constant 0 : index
    %5 = vector.load %arg4[%c0_0, %c0_1] : memref<1x128xf32, #tpu.memory_space<vmem>>, vector<1x128xf32>
    %6 = vector.broadcast %5 : vector<1x128xf32> to vector<32x128xf32>
    %7 = arith.mulf %4, %6 : vector<32x128xf32>
    %cst = arith.constant dense<0.000000e+00> : vector<32xf32>
    %8 = vector.multi_reduction <add>, %7, %cst [1] : vector<32x128xf32> to vector<32xf32>
    %9 = vector.shape_cast %8 : vector<32xf32> to vector<32x1xf32>
    %c0_2 = arith.constant 0 : index
    %c0_3 = arith.constant 0 : index
    %10 = vector.load %arg3[%c0_2, %c0_3] : memref<1x64xf32, #tpu.memory_space<vmem>>, vector<1x64xf32>
    %11 = vector.broadcast %9 : vector<32x1xf32> to vector<32x64xf32>
    %12 = vector.broadcast %10 : vector<1x64xf32> to vector<32x64xf32>
    %13 = arith.addf %11, %12 : vector<32x64xf32>
    %cst_4 = arith.constant 2.000000e-01 : f32
    %14 = vector.broadcast %cst_4 : f32 to vector<32x64xf32>
    %15 = arith.mulf %14, %13 : vector<32x64xf32>
    %16 = arith.maximumf %13, %15 : vector<32x64xf32>
    %c0_5 = arith.constant 0 : index
    %c0_6 = arith.constant 0 : index
    %17 = vector.load %arg1[%c0_5, %c0_6] : memref<32x64xi8, #tpu.memory_space<vmem>>, vector<32x64xi8>
    %c0_i8 = arith.constant 0 : i8
    %18 = vector.broadcast %c0_i8 : i8 to vector<32x64xi8>
    %19 = arith.cmpi ne, %17, %18 : vector<32x64xi8>
    %cst_7 = arith.constant -1.000000e+30 : f32
    %20 = vector.broadcast %cst_7 : f32 to vector<32x64xf32>
    %21 = arith.select %19, %16, %20 : vector<32x64xi1>, vector<32x64xf32>
    %cst_8 = arith.constant dense<0xFF800000> : vector<32xf32>
    %22 = vector.multi_reduction <maximumf>, %21, %cst_8 [1] : vector<32x64xf32> to vector<32xf32>
    %23 = vector.shape_cast %22 : vector<32xf32> to vector<32x1xf32>
    %24 = vector.broadcast %23 : vector<32x1xf32> to vector<32x64xf32>
    %25 = arith.subf %21, %24 : vector<32x64xf32>
    %26 = math.exp %25 : vector<32x64xf32>
    %cst_9 = arith.constant dense<0.000000e+00> : vector<32xf32>
    %27 = vector.multi_reduction <add>, %26, %cst_9 [1] : vector<32x64xf32> to vector<32xf32>
    %28 = vector.shape_cast %27 : vector<32xf32> to vector<32x1xf32>
    %29 = arith.truncf %26 : vector<32x64xf32> to vector<32x64xbf16>
    %c0_10 = arith.constant 0 : index
    %c0_11 = arith.constant 0 : index
    %30 = vector.load %arg2[%c0_10, %c0_11] : memref<64x128xbf16, #tpu.memory_space<vmem>>, vector<64x128xbf16>
    %cst_12 = arith.constant dense<0.000000e+00> : vector<32x128xf32>
    %31 = tpu.matmul %29, %30, %cst_12 {dimension_numbers = #tpu.dot_dimension_numbers<[1], [0], [0], [1], [0, 0, 1, 1], [], []>} : vector<32x64xbf16>, vector<64x128xbf16>, vector<32x128xf32> -> vector<32x128xf32>
    %32 = tpu.reciprocal %28 {approx = true} : vector<32x1xf32> -> vector<32x1xf32>
    %33 = vector.broadcast %32 : vector<32x1xf32> to vector<32x128xf32>
    %34 = arith.mulf %31, %33 : vector<32x128xf32>
    %c0_13 = arith.constant 0 : index
    %c0_14 = arith.constant 0 : index
    %35 = vector.load %arg5[%c0_13, %c0_14] : memref<1x128xf32, #tpu.memory_space<vmem>>, vector<1x128xf32>
    %36 = vector.broadcast %35 : vector<1x128xf32> to vector<32x128xf32>
    %37 = arith.addf %34, %36 : vector<32x128xf32>
    %cst_15 = arith.constant 0.000000e+00 : f32
    %38 = vector.broadcast %cst_15 : f32 to vector<32x128xf32>
    %39 = arith.maximumf %37, %38 : vector<32x128xf32>
    %40 = arith.truncf %39 : vector<32x128xf32> to vector<32x128xbf16>
    %c0_16 = arith.constant 0 : index
    %c0_17 = arith.constant 0 : index
    %41 = vector.load %arg6[%c0_16, %c0_17] : memref<32x128xbf16, #tpu.memory_space<vmem>>, vector<32x128xbf16>
    tpu.vector_store %arg6[%c0_16, %c0_17], %40 {strides = array<i32>} : memref<32x128xbf16, #tpu.memory_space<vmem>>, vector<32x128xbf16>,
    return
  }
  func.func @transform_0(%arg0: i32) -> (i32, i32) {
    %c0_i32 = arith.constant 0 : i32
    %c0_i32_0 = arith.constant 0 : i32
    return %arg0, %c0_i32 : i32, i32
  }
  func.func @transform_1(%arg0: i32) -> (i32, i32) {
    %c0_i32 = arith.constant 0 : i32
    %c0_i32_0 = arith.constant 0 : i32
    %c0_i32_1 = arith.constant 0 : i32
    return %c0_i32, %c0_i32_0 : i32, i32
  }
  func.func @transform_2(%arg0: i32) -> (i32, i32) {
    %c0_i32 = arith.constant 0 : i32
    %c0_i32_0 = arith.constant 0 : i32
    %c0_i32_1 = arith.constant 0 : i32
    return %c0_i32, %c0_i32_0 : i32, i32
  }
  func.func @transform_3(%arg0: i32) -> (i32, i32) {
    %c0_i32 = arith.constant 0 : i32
    %c0_i32_0 = arith.constant 0 : i32
    %c0_i32_1 = arith.constant 0 : i32
    return %c0_i32, %c0_i32_0 : i32, i32
  }
  func.func @transform_4(%arg0: i32) -> (i32, i32) {
    %c0_i32 = arith.constant 0 : i32
    %c0_i32_0 = arith.constant 0 : i32
    %c0_i32_1 = arith.constant 0 : i32
    return %c0_i32, %c0_i32_0 : i32, i32
  }
  func.func @transform_5(%arg0: i32) -> (i32, i32) {
    %c0_i32 = arith.constant 0 : i32
    %c0_i32_0 = arith.constant 0 : i32
    return %arg0, %c0_i32 : i32, i32
  }
}

module attributes {stable_mosaic.version = 11 : i64} {
  func.func @_attn_kernel(%arg0: i32, %arg1: memref<32x64xi8, #tpu.memory_space<vmem>>, %arg2: memref<64x128xbf16, #tpu.memory_space<vmem>>, %arg3: memref<1x64xf32, #tpu.memory_space<vmem>>, %arg4: memref<1x128xf32, #tpu.memory_space<vmem>>, %arg5: memref<1x128xf32, #tpu.memory_space<vmem>>, %arg6: memref<32x128xf32, #tpu.memory_space<vmem>>) attributes {dimension_semantics = [#tpu.dimension_semantics<parallel>], iteration_bounds = array<i64: 2>, scalar_prefetch = 0 : i64, scratch_operands = 0 : i64, tpu.core_type = #tpu.core_type<tc>, window_params = [{transform_indices = @transform_0, window_bounds = array<i64: 32, 64>}, {pipeline_mode = #tpu.pipeline_mode<synchronous>, transform_indices = @transform_1, window_bounds = array<i64: 64, 128>}, {pipeline_mode = #tpu.pipeline_mode<synchronous>, transform_indices = @transform_2, window_bounds = array<i64: 1, 64>}, {pipeline_mode = #tpu.pipeline_mode<synchronous>, transform_indices = @transform_3, window_bounds = array<i64: 1, 128>}, {pipeline_mode = #tpu.pipeline_mode<synchronous>, transform_indices = @transform_4, window_bounds = array<i64: 1, 128>}, {transform_indices = @transform_5, window_bounds = array<i64: 32, 128>}]} {
    %c32_i32 = arith.constant 32 : i32
    %0 = arith.muli %arg0, %c32_i32 : i32
    %1 = tpu.assume_multiple %0, 32 : i32
    %2 = arith.index_cast %1 : i32 to index
    %c0 = arith.constant 0 : index
    %3 = vector.load %arg2[%2, %c0] : memref<64x128xbf16, #tpu.memory_space<vmem>>, vector<32x128xbf16>
    %4 = arith.extf %3 : vector<32x128xbf16> to vector<32x128xf32>
    %c0_0 = arith.constant 0 : index
    %c0_1 = arith.constant 0 : index
    %5 = vector.load %arg4[%c0_0, %c0_1] : memref<1x128xf32, #tpu.memory_space<vmem>>, vector<1x128xf32>
    %6 = vector.broadcast %5 : vector<1x128xf32> to vector<32x128xf32>
    %7 = arith.mulf %4, %6 : vector<32x128xf32>
    %cst = arith.constant dense<0.000000e+00> : vector<32xf32>
    %8 = vector.multi_reduction <add>, %7, %cst [1] : vector<32x128xf32> to vector<32xf32>
    %9 = vector.shape_cast %8 : vector<32xf32> to vector<32x1xf32>
    %c0_2 = arith.constant 0 : index
    %c0_3 = arith.constant 0 : index
    %10 = vector.load %arg3[%c0_2, %c0_3] : memref<1x64xf32, #tpu.memory_space<vmem>>, vector<1x64xf32>
    %11 = vector.broadcast %9 : vector<32x1xf32> to vector<32x64xf32>
    %12 = vector.broadcast %10 : vector<1x64xf32> to vector<32x64xf32>
    %13 = arith.addf %11, %12 : vector<32x64xf32>
    %cst_4 = arith.constant 2.000000e-01 : f32
    %14 = vector.broadcast %cst_4 : f32 to vector<32x64xf32>
    %15 = arith.mulf %14, %13 : vector<32x64xf32>
    %16 = arith.maximumf %13, %15 : vector<32x64xf32>
    %c0_5 = arith.constant 0 : index
    %c0_6 = arith.constant 0 : index
    %17 = vector.load %arg1[%c0_5, %c0_6] : memref<32x64xi8, #tpu.memory_space<vmem>>, vector<32x64xi8>
    %c0_i8 = arith.constant 0 : i8
    %18 = vector.broadcast %c0_i8 : i8 to vector<32x64xi8>
    %19 = arith.cmpi ne, %17, %18 : vector<32x64xi8>
    %cst_7 = arith.constant -1.000000e+30 : f32
    %20 = vector.broadcast %cst_7 : f32 to vector<32x64xf32>
    %21 = arith.select %19, %16, %20 : vector<32x64xi1>, vector<32x64xf32>
    %cst_8 = arith.constant dense<0xFF800000> : vector<32xf32>
    %22 = vector.multi_reduction <maximumf>, %21, %cst_8 [1] : vector<32x64xf32> to vector<32xf32>
    %23 = vector.shape_cast %22 : vector<32xf32> to vector<32x1xf32>
    %24 = vector.broadcast %23 : vector<32x1xf32> to vector<32x64xf32>
    %25 = arith.subf %21, %24 : vector<32x64xf32>
    %26 = math.exp %25 : vector<32x64xf32>
    %cst_9 = arith.constant dense<0.000000e+00> : vector<32xf32>
    %27 = vector.multi_reduction <add>, %26, %cst_9 [1] : vector<32x64xf32> to vector<32xf32>
    %28 = vector.shape_cast %27 : vector<32xf32> to vector<32x1xf32>
    %29 = arith.truncf %26 : vector<32x64xf32> to vector<32x64xbf16>
    %c0_10 = arith.constant 0 : index
    %c0_11 = arith.constant 0 : index
    %30 = vector.load %arg2[%c0_10, %c0_11] : memref<64x128xbf16, #tpu.memory_space<vmem>>, vector<64x128xbf16>
    %cst_12 = arith.constant dense<0.000000e+00> : vector<32x128xf32>
    %31 = tpu.matmul %29, %30, %cst_12 {dimension_numbers = #tpu.dot_dimension_numbers<[1], [0], [0], [1], [0, 0, 1, 1], [], []>} : vector<32x64xbf16>, vector<64x128xbf16>, vector<32x128xf32> -> vector<32x128xf32>
    %32 = tpu.reciprocal %28 {approx = true} : vector<32x1xf32> -> vector<32x1xf32>
    %33 = vector.broadcast %32 : vector<32x1xf32> to vector<32x128xf32>
    %34 = arith.mulf %31, %33 : vector<32x128xf32>
    %c0_13 = arith.constant 0 : index
    %c0_14 = arith.constant 0 : index
    %35 = vector.load %arg5[%c0_13, %c0_14] : memref<1x128xf32, #tpu.memory_space<vmem>>, vector<1x128xf32>
    %36 = vector.broadcast %35 : vector<1x128xf32> to vector<32x128xf32>
    %37 = arith.addf %34, %36 : vector<32x128xf32>
    %c0_15 = arith.constant 0 : index
    %c0_16 = arith.constant 0 : index
    %38 = vector.load %arg6[%c0_15, %c0_16] : memref<32x128xf32, #tpu.memory_space<vmem>>, vector<32x128xf32>
    tpu.vector_store %arg6[%c0_15, %c0_16], %37 {strides = array<i32>} : memref<32x128xf32, #tpu.memory_space<vmem>>, vector<32x128xf32>,
    return
  }
  func.func @transform_0(%arg0: i32) -> (i32, i32) {
    %c0_i32 = arith.constant 0 : i32
    %c0_i32_0 = arith.constant 0 : i32
    return %arg0, %c0_i32 : i32, i32
  }
  func.func @transform_1(%arg0: i32) -> (i32, i32) {
    %c0_i32 = arith.constant 0 : i32
    %c0_i32_0 = arith.constant 0 : i32
    %c0_i32_1 = arith.constant 0 : i32
    return %c0_i32, %c0_i32_0 : i32, i32
  }
  func.func @transform_2(%arg0: i32) -> (i32, i32) {
    %c0_i32 = arith.constant 0 : i32
    %c0_i32_0 = arith.constant 0 : i32
    %c0_i32_1 = arith.constant 0 : i32
    return %c0_i32, %c0_i32_0 : i32, i32
  }
  func.func @transform_3(%arg0: i32) -> (i32, i32) {
    %c0_i32 = arith.constant 0 : i32
    %c0_i32_0 = arith.constant 0 : i32
    %c0_i32_1 = arith.constant 0 : i32
    return %c0_i32, %c0_i32_0 : i32, i32
  }
  func.func @transform_4(%arg0: i32) -> (i32, i32) {
    %c0_i32 = arith.constant 0 : i32
    %c0_i32_0 = arith.constant 0 : i32
    %c0_i32_1 = arith.constant 0 : i32
    return %c0_i32, %c0_i32_0 : i32, i32
  }
  func.func @transform_5(%arg0: i32) -> (i32, i32) {
    %c0_i32 = arith.constant 0 : i32
    %c0_i32_0 = arith.constant 0 : i32
    return %arg0, %c0_i32 : i32, i32
  }
}

</mosaic_0001>

<bundles_post_ra>
// kernel: gat_forward.4
= control target key start
LH: loop header
LB: loop body
LE: loop exit
PB: predicated region body
PF: predicated region fallthrough
CT: control target
= control target key end

     0   :  { %s464_s9 = smov 0   ;;  %s508_s0 = inlined_call_operand.vmem [shape: bf16[64,128], index: 0, kind: input, shape index: {}]   ;;  %s509_s1 = inlined_call_operand.vmem [shape: bf16[128,128], index: 1, kind: input, shape index: {}]   ;;  %s510_s2 = inlined_call_operand.vmem [shape: bf16[64,128], index: 2, kind: output, shape index: {}]  }
   0x1 LB: > { %s353_s10 = sadd.s32 4294967295, %s447_s9   ;;  %p357_p0 = scmp.ge.s32.totalorder %s447_s9, 1  ;;  %s447_s9 = sphi %s464_s9, %s12_s9  }
   0x2   : > { %p113_p1 = scmp.lt.s32.totalorder %s447_s9, 3 }
   0x4   : > { %p114_p2 = pnand %p357_p0, %p113_p1 }
   0x5   : > { %v431_v0 = vld [vmem:[%s509_s1] sm:$0xff] (!%p114_p2)   ;;  %s358_s13 = sshll.u32 (!%p114_p2), %s353_s10, 2  ;;  %v432_v1 = vld [vmem:[%s509_s1 + $0x8] sm:$0xff] (!%p114_p2)   ;;  %v433_v2 = vld [vmem:[%s509_s1 + $0x10] sm:$0xff] (!%p114_p2)  }
   0x6   : > { %117 = sbr.rel (%p114_p2) target bundleno = 256 (0x100), region = 28  ;;  %p136_p3 = scmp.lt.s32.totalorder (!%p114_p2), %s358_s13, 7  ;;  %403 = vmatprep.subr.bf16.mxu0 (!%p114_p2), %v431_v0  ;;  %v434_v3 = vld [vmem:[%s509_s1 + $0x18] sm:$0xff] (!%p114_p2)   ;;  %v435_v5 = vld [vmem:[%s509_s1 + $0x20] sm:$0xff] (!%p114_p2)   ;;  %v436_v6 = vld [vmem:[%s509_s1 + $0x28] sm:$0xff] (!%p114_p2)  }
   0x7   : > { %404 = vmatpush3.bf16.msra.mxu0 (!%p114_p2), %v431_v0  ;;  %v437_v7 = vld [vmem:[%s509_s1 + $0x30] sm:$0xff] (!%p114_p2)   ;;  %v438_v8 = vld [vmem:[%s509_s1 + $0x38] sm:$0xff] (!%p114_p2)  }
   0x8   : > { %405 = vmatprep.subr.bf16.mxu0 (!%p114_p2), %v432_v1 }
   0xb   : > { %406 = vmatpush3.bf16.msra.mxu0 (!%p114_p2), %v432_v1 }
   0xc   : > { %407 = vmatprep.subr.bf16.mxu0 (!%p114_p2), %v433_v2 }
   0xd   : > { %s512_s13 = smov (!%p136_p3, %s358_s13), 7 }
   0xe   : > { %s359_s18 = sshll.u32 %s512_s13, 2 }
   0xf   : > { %s139_s21 = scalar_lea.vmem %s508_s0, %s359_s18  ;;  %408 = vmatpush3.bf16.msra.mxu0 %v433_v2  ;;  %s145_s6 = scalar_lea.vmem %s510_s2, %s359_s18 }
  0x10   : > { %v439_v4 = vld [vmem:[%s139_s21] sm:$0xff]   ;;  %409 = vmatprep.subr.bf16.mxu0 %v434_v3  ;;  %v440_v9 = vld [vmem:[%s139_s21 + $0x8] sm:$0xff]  }
  0x11   : > { %419 = vmatprep.mubr.bf16.mxu0 %v439_v4 }
  0x13   : > { %410 = vmatpush3.bf16.msra.mxu0 %v434_v3 }
  0x14   : > { %411 = vmatprep.subr.bf16.mxu0 %v435_v5 }
  0x17   : > { %412 = vmatpush3.bf16.msra.mxu0 %v435_v5 }
  0x18   : > { %413 = vmatprep.subr.bf16.mxu0 %v436_v6 }
  0x1b   : > { %414 = vmatpush3.bf16.msra.mxu0 %v436_v6 }
  0x1c   : > { %415 = vmatprep.subr.bf16.mxu0 %v437_v7 }
  0x1f   : > { %416 = vmatpush3.bf16.msra.mxu0 %v437_v7 }
  0x20   : > { %417 = vmatprep.subr.bf16.mxu0 %v438_v8 }
  0x23   : > { %418 = vmatpush3.bf16.msra.mxu0 %v438_v8 }
  0x26   : > { %420 = vmatmul.mubr.bf16.vlgmr.msra.gmra.mrb[0].mxu0 %v440_v9 }
  0xf9   : > { %v421_v10 = vpop.f32.mrb[0].mxu0 }
  0xfa   : > { %v262_v11 = vpop.f32.mrb[1].mxu0 }
  0xfb   : > { %v422_v12 = vpop.f32.mrb[2].mxu0 }
  0xfc   : > { %v390_v13 = vpack.c.bf16 %v422_v12, %v421_v10  ;;  %v265_v14 = vpop.f32.mrb[3].mxu0 }
  0xfd   : > { %v385_v15 = vpack.c.bf16 %v265_v14, %v262_v11 }
  0xfe   : > { %392 = vst [vmem:[%s145_s6 + $0x8] sm:$0xff] %v390_v13  }
  0xff   : > { %386 = vst [vmem:[%s145_s6] sm:$0xff] %v385_v15  }
 0x100 PF: > { %s12_s9 = sadd.s32 1, %s447_s9  }
 0x101   : > { %p9_p4 = scmp.ge.s32.totalorder %s12_s9, 4  }
 0x103   :  { %11 = sbr.rel (!%p9_p4) target bundleno = 1 (0x1), region = 58 }

// kernel: gat_forward.5
= control target key start
LH: loop header
LB: loop body
LE: loop exit
PB: predicated region body
PF: predicated region fallthrough
CT: control target
= control target key end

     0   :  { %s669_s18 = smov 0   ;;  %s724_s0 = inlined_call_operand.vmem [shape: s8[64,64], index: 0, kind: input, shape index: {}]   ;;  %s725_s1 = inlined_call_operand.vmem [shape: bf16[64,128], index: 1, kind: input, shape index: {}]   ;;  %s726_s2 = inlined_call_operand.vmem [shape: f32[1,64], index: 2, kind: input, shape index: {}]   ;;  %s727_s3 = inlined_call_operand.vmem [shape: f32[1,128], index: 3, kind: input, shape index: {}]   ;;  %s728_s4 = inlined_call_operand.vmem [shape: f32[1,128], index: 4, kind: input, shape index: {}]   ;;  %s729_s5 = inlined_call_operand.vmem [shape: bf16[64,128], index: 5, kind: output, shape index: {}]  }
   0x1 LB: > { %s533_s19 = sadd.s32 4294967295, %s636_s18   ;;  %p537_p0 = scmp.ge.s32.totalorder %s636_s18, 1  ;;  %s636_s18 = sphi %s669_s18, %s15_s18  }
   0x2   : > { %p188_p1 = scmp.lt.s32.totalorder %s636_s18, 3 }
   0x4   : > { %p189_p2 = pnand %p537_p0, %p188_p1 }
   0x5   : > { %s542_s20 = sshll.u32 (!%p189_p2), %s533_s19, 5  ;;  %v544_v0 = vld [vmem:[%s727_s3] ss:$0 sm:$0xff] (!%p189_p2)  ;;  %s538_s28 = sshll.u32 (!%p189_p2), %s533_s19, 2  ;;  %v638_v14 = vmov (!%p189_p2), 0   ;;  %vm306_vm5 = vcmask (!%p189_p2), 523264  }
   0x6   : > { %192 = sbr.rel (%p189_p2) target bundleno = 555 (0x22b), region = 40  ;;  %s232_s21 = sshra.s32 (!%p189_p2), %s542_s20, 3  ;;  %v545_v17 = vld [vmem:[%s726_s2] ss:$0 sm:$0xff] (!%p189_p2)  ;;  %v611_v50 = vld [vmem:[%s725_s1 + $0x8] sm:$0xff] (!%p189_p2)   ;;  %v612_v51 = vld [vmem:[%s725_s1 + $0x10] sm:$0xff] (!%p189_p2)  }
   0x7   : > { %s543_s22 = sshll.u32 (!%p189_p2), %s232_s21, 2  ;;  %p217_p3 = scmp.lt.s32.totalorder (!%p189_p2), %s538_s28, 7  ;;  %v610_v49 = vld [vmem:[%s725_s1] sm:$0xff] (!%p189_p2)   ;;  %v613_v52 = vld [vmem:[%s725_s1 + $0x18] sm:$0xff] (!%p189_p2)  }
   0x8   : > { %s235_s27 = scalar_lea.vmem (!%p189_p2), %s725_s1, %s543_s22  ;;  %589 = vmatprep.subr.bf16.mxu0 (!%p189_p2), %v610_v49 }
   0x9   : > { %v564_v1 = vld [vmem:[%s235_s27] sm:$0xff] (!%p189_p2)   ;;  %v581_v2 = vld [vmem:[%s235_s27 + $0x8] sm:$0xff] (!%p189_p2)   ;;  %590 = vmatpush3.bf16.msra.mxu0 (!%p189_p2), %v610_v49 }
   0xa   : > { %v565_v3 = vunpack.c.l.bf16 (!%p189_p2), %v564_v1  ;;  %v569_v4 = vunpack.c.l.bf16 (!%p189_p2), %v581_v2  ;;  %v566_v5 = vunpack.c.h.bf16 (!%p189_p2), %v564_v1  ;;  %v570_v6 = vunpack.c.h.bf16 (!%p189_p2), %v581_v2  ;;  %591 = vmatprep.subr.bf16.mxu0 (!%p189_p2), %v611_v50 }
   0xc   : > { %v251_v7 = vmul.f32 (!%p189_p2), %v565_v3, %v544_v0  ;;  %v253_v8 = vmul.f32 (!%p189_p2), %v569_v4, %v544_v0  ;;  %v252_v9 = vmul.f32 (!%p189_p2), %v566_v5, %v544_v0  ;;  %v254_v10 = vmul.f32 (!%p189_p2), %v570_v6, %v544_v0 }
   0xd   : > { %s731_s28 = smov (!%p217_p3, %s538_s28), 7  ;;  %592 = vmatpush3.bf16.msra.mxu0 %v611_v50 }
   0xe   : > { %255 = vadd.xlane.f32.xlu0 %v251_v7  ;;  %259 = vadd.xlane.f32.xlu1 %v253_v8  ;;  %s539_s29 = sshll.u32 %s731_s28, 1  ;;  %s541_s21 = sshll.u32 %s731_s28, 2 }
   0xf   : > { %s220_s7 = scalar_lea.vmem %s724_s0, %s539_s29  ;;  %593 = vmatprep.subr.bf16.mxu0 %v612_v51  ;;  %s226_s24 = scalar_lea.vmem %s729_s5, %s541_s21 }
  0x10   : > { %v282_v11 = vld [vmem:[%s220_s7] sm:$0x3]  ;;  %v284_v12 = vld [vmem:[%s220_s7 + $0x4] sm:$0x3]  ;;  %v283_v13 = vld [vmem:[%s220_s7 + $0x2] sm:$0x3] }
  0x11   : > { %vm286_vm0 = vnez %v282_v11  ;;  %vm288_vm1 = vnez %v284_v12  ;;  %v285_v16 = vld [vmem:[%s220_s7 + $0x6] sm:$0x3]  ;;  %vm287_vm2 = vnez %v283_v13  ;;  %594 = vmatpush3.bf16.msra.mxu0 %v612_v51 }
  0x12   : > { %257 = vadd.xlane.f32.xlu0 %v252_v9  ;;  %261 = vadd.xlane.f32.xlu1 %v254_v10  ;;  %v290_v15 = vsel %vm286_vm0, 16843009, %v638_v14  ;;  %v292_v18 = vsel %vm288_vm1, 16843009, %v638_v14  ;;  %vm289_vm3 = vnez %v285_v16  ;;  %v291_v24 = vsel %vm287_vm2, 16843009, %v638_v14 }
  0x13   : > { %v294_v21 = vunpack.c.0.s8 %v290_v15  ;;  %v296_v25 = vunpack.c.0.s8 %v292_v18  ;;  %v293_v28 = vsel %vm289_vm3, 16843009, %v638_v14  ;;  %v295_v31 = vunpack.c.0.s8 %v291_v24  ;;  %595 = vmatprep.subr.bf16.mxu0 %v613_v52 }
  0x14   : > { %v297_v36 = vunpack.c.0.s8 %v293_v28 }
  0x15   : > { %vm298_vm4 = vcmp.ne.s32.totalorder %v294_v21, 0  ;;  %vm300_vm6 = vcmp.ne.s32.totalorder %v296_v25, 0  ;;  %vm299_vm7 = vcmp.ne.s32.totalorder %v295_v31, 0  ;;  %596 = vmatpush3.bf16.msra.mxu0 %v613_v52 }
  0x16   : > { %vm301_vm8 = vcmp.ne.s32.totalorder %v297_v36, 0 }
  0x9b   : > { %v256_v19 = vpop.xlane.xlu0 %255  ;;  %v260_v20 = vpop.xlane.xlu1 %259 }
  0x9c   : > { %v270_v22 = vadd.f32 %v545_v17, %v256_v19  ;;  %v272_v23 = vadd.f32 %v545_v17, %v260_v20 }
  0x9e   : > { %v274_v26 = vmul.f32 0.2, %v270_v22  ;;  %v276_v27 = vmul.f32 0.2, %v272_v23 }
  0x9f   : > { %v258_v29 = vpop.xlane.xlu0 %257  ;;  %v262_v30 = vpop.xlane.xlu1 %261 }
  0xa0   : > { %v278_v32 = vmax.f32 %v270_v22, %v274_v26  ;;  %v280_v33 = vmax.f32 %v272_v23, %v276_v27  ;;  %v271_v34 = vadd.f32 %v545_v17, %v258_v29  ;;  %v273_v35 = vadd.f32 %v545_v17, %v262_v30  ;;  %v552_v17 = vld [vmem:[%s728_s4] ss:$0 sm:$0xff] }
  0xa2   : > { %v275_v37 = vmul.f32 0.2, %v271_v34  ;;  %v277_v38 = vmul.f32 0.2, %v273_v35  ;;  %v302_v39 = vsel %vm298_vm4, %v278_v32, -1e+30 }
  0xa3   : > { %v307_v40 = vsel %vm306_vm5, %v302_v39, -inf  ;;  %v304_v43 = vsel %vm300_vm6, %v280_v33, -1e+30 }
  0xa4   : > { %v279_v41 = vmax.f32 %v271_v34, %v275_v37  ;;  %v281_v42 = vmax.f32 %v273_v35, %v277_v38  ;;  %308 = vmax.xlane.f32.xlu0 %v307_v40  ;;  %v313_v46 = vsel %vm306_vm5, %v304_v43, -inf }
  0xa6   : > { %v303_v44 = vsel %vm299_vm7, %v279_v41, -1e+30  ;;  %v305_v47 = vsel %vm301_vm8, %v281_v42, -1e+30 }
  0xa7   : > { %v310_v45 = vsel %vm306_vm5, %v303_v44, -inf  ;;  %v316_v48 = vsel %vm306_vm5, %v305_v47, -inf }
  0xa8   : > { %311 = vmax.xlane.f32.xlu1 %v310_v45  ;;  %314 = vmax.xlane.f32.xlu0 %v313_v46 }
  0xac   : > { %317 = vmax.xlane.f32.xlu1 %v316_v48 }
 0x131   : > { %v309_v53 = vpop.xlane.xlu0 %308 }
 0x132   : > { %v319_v54 = vsub.f32 %v302_v39, %v309_v53 }
 0x134   : > { %v323_v55 = vmul.f32 1.442695, %v319_v54 }
 0x135   : > { %v312_v56 = vpop.xlane.xlu1 %311  ;;  %v315_v57 = vpop.xlane.xlu0 %314 }
 0x136   : > { %614 = vpow2.f32 %v323_v55  ;;  %v320_v58 = vsub.f32 %v303_v44, %v312_v56  ;;  %v321_v59 = vsub.f32 %v304_v43, %v315_v57 }
 0x138   : > { %v325_v60 = vmul.f32 1.442695, %v320_v58  ;;  %v327_v61 = vmul.f32 1.442695, %v321_v59 }
 0x139   : > { %v318_v62 = vpop.xlane.xlu1 %317 }
 0x13a   : > { %616 = vpow2.f32 %v325_v60  ;;  %v322_v63 = vsub.f32 %v305_v47, %v318_v62 }
 0x13b   : > { %618 = vpow2.f32 %v327_v61 }
 0x13c   : > { %v329_v0 = vmul.f32 1.442695, %v322_v63 }
 0x13e   : > { %620 = vpow2.f32 %v329_v0 }
 0x140   : > { %v615_v1 = vpop.eup %614 }
 0x141   : > { %v331_v2 = vsel %vm306_vm5, %v615_v1, 0.0 }
 0x142   : > { %332 = vadd.xlane.f32.xlu0 %v331_v2 }
 0x144   : > { %v617_v3 = vpop.eup %616 }
 0x145   : > { %v619_v4 = vpop.eup %618  ;;  %v334_v5 = vsel %vm306_vm5, %v617_v3, 0.0  ;;  %v343_v6 = vpack.c.bf16 %v617_v3, %v615_v1 }
 0x146   : > { %335 = vadd.xlane.f32.xlu1 %v334_v5  ;;  %v337_v7 = vsel %vm306_vm5, %v619_v4, 0.0 }
 0x147   : > { %338 = vadd.xlane.f32.xlu0 %v337_v7  ;;  %597 = vmatprep.mubr.msk.bf16.mxu0 %vm306_vm5, %v343_v6 }
 0x148   : > { %v621_v8 = vpop.eup %620 }
 0x149   : > { %v340_v9 = vsel %vm306_vm5, %v621_v8, 0.0  ;;  %v344_v10 = vpack.c.bf16 %v621_v8, %v619_v4 }
 0x14a   : > { %341 = vadd.xlane.f32.xlu1 %v340_v9 }
 0x14b   : > { %598 = vmatmul.mubr.msk.bf16.vlgmr.msra.gmra.mrb[0].mxu0 %vm306_vm5, %v344_v10 }
 0x1cf   : > { %v333_v11 = vpop.xlane.xlu0 %332 }
 0x1d3   : > { %v336_v12 = vpop.xlane.xlu1 %335 }
 0x1d4   : > { %v339_v13 = vpop.xlane.xlu0 %338 }
 0x1d5   : > { %622 = vrcp.f32 %v339_v13 }
 0x1d6   : > { %624 = vrcp.f32 %v333_v11 }
 0x1d7   : > { %v342_v14 = vpop.xlane.xlu1 %341 }
 0x1d8   : > { %626 = vrcp.f32 %v342_v14 }
 0x1d9   : > { %628 = vrcp.f32 %v336_v12 }
 0x1df   : > { %v623_v15 = vpop.eup %622 }
 0x1e0   : > { %v625_v18 = vpop.eup %624 }
 0x1e2   : > { %v627_v21 = vpop.eup %626 }
 0x1e3   : > { %v629_v24 = vpop.eup %628 }
 0x21e   : > { %v599_v16 = vpop.f32.mrb[0].mxu0 }
 0x21f   : > { %v438_v19 = vmul.f32 %v623_v15, %v599_v16  ;;  %v417_v20 = vpop.f32.mrb[1].mxu0 }
 0x220   : > { %v436_v22 = vmul.f32 %v625_v18, %v417_v20  ;;  %v600_v23 = vpop.f32.mrb[2].mxu0 }
 0x221   : > { %v449_v25 = vadd.f32 %v552_v17, %v438_v19  ;;  %v439_v26 = vmul.f32 %v627_v21, %v600_v23  ;;  %v420_v27 = vpop.f32.mrb[3].mxu0 }
 0x222   : > { %v447_v28 = vadd.f32 %v552_v17, %v436_v22  ;;  %v437_v29 = vmul.f32 %v629_v24, %v420_v27 }
 0x223   : > { %v450_v30 = vadd.f32 %v552_v17, %v439_v26  ;;  %v453_v32 = vmax.f32 %v449_v25, 0.0 }
 0x224   : > { %v448_v31 = vadd.f32 %v552_v17, %v437_v29  ;;  %v451_v34 = vmax.f32 %v447_v28, 0.0 }
 0x225   : > { %v454_v33 = vmax.f32 %v450_v30, 0.0 }
 0x226   : > { %v452_v35 = vmax.f32 %v448_v31, 0.0 }
 0x227   : > { %v579_v36 = vpack.c.bf16 %v454_v33, %v453_v32 }
 0x228   : > { %v574_v37 = vpack.c.bf16 %v452_v35, %v451_v34 }
 0x229   : > { %582 = vst [vmem:[%s226_s24 + $0x8] sm:$0xff] %v579_v36  }
 0x22a   : > { %575 = vst [vmem:[%s226_s24] sm:$0xff] %v574_v37  }
 0x22b PF: > { %s15_s18 = sadd.s32 1, %s636_s18  }
 0x22c   : > { %p12_p4 = scmp.ge.s32.totalorder %s15_s18, 4  }
 0x22e   :  { %14 = sbr.rel (!%p12_p4) target bundleno = 1 (0x1), region = 71 }

// kernel: gat_forward.7
= control target key start
LH: loop header
LB: loop body
LE: loop exit
PB: predicated region body
PF: predicated region fallthrough
CT: control target
= control target key end

     0   :  { %s630_s18 = smov 0   ;;  %s685_s0 = inlined_call_operand.vmem [shape: s8[64,64], index: 0, kind: input, shape index: {}]   ;;  %s686_s1 = inlined_call_operand.vmem [shape: bf16[64,128], index: 1, kind: input, shape index: {}]   ;;  %s687_s2 = inlined_call_operand.vmem [shape: f32[1,64], index: 2, kind: input, shape index: {}]   ;;  %s688_s3 = inlined_call_operand.vmem [shape: f32[1,128], index: 3, kind: input, shape index: {}]   ;;  %s689_s4 = inlined_call_operand.vmem [shape: f32[1,128], index: 4, kind: input, shape index: {}]   ;;  %s690_s5 = inlined_call_operand.vmem [shape: f32[64,128], index: 5, kind: output, shape index: {}]  }
   0x1 LB: > { %s513_s19 = sadd.s32 4294967295, %s597_s18   ;;  %p517_p0 = scmp.ge.s32.totalorder %s597_s18, 1  ;;  %s597_s18 = sphi %s630_s18, %s15_s18  }
   0x2   : > { %p188_p1 = scmp.lt.s32.totalorder %s597_s18, 3 }
   0x4   : > { %p189_p2 = pnand %p517_p0, %p188_p1 }
   0x5   : > { %s522_s20 = sshll.u32 (!%p189_p2), %s513_s19, 5  ;;  %v524_v0 = vld [vmem:[%s688_s3] ss:$0 sm:$0xff] (!%p189_p2)  ;;  %s518_s28 = sshll.u32 (!%p189_p2), %s513_s19, 2  ;;  %v599_v14 = vmov (!%p189_p2), 0   ;;  %vm306_vm5 = vcmask (!%p189_p2), 523264  }
   0x6   : > { %192 = sbr.rel (%p189_p2) target bundleno = 551 (0x227), region = 40  ;;  %s232_s21 = sshra.s32 (!%p189_p2), %s522_s20, 3  ;;  %v525_v17 = vld [vmem:[%s687_s2] ss:$0 sm:$0xff] (!%p189_p2)  ;;  %v572_v50 = vld [vmem:[%s686_s1 + $0x8] sm:$0xff] (!%p189_p2)   ;;  %v573_v51 = vld [vmem:[%s686_s1 + $0x10] sm:$0xff] (!%p189_p2)  }
   0x7   : > { %s523_s22 = sshll.u32 (!%p189_p2), %s232_s21, 2  ;;  %p217_p3 = scmp.lt.s32.totalorder (!%p189_p2), %s518_s28, 7  ;;  %v571_v49 = vld [vmem:[%s686_s1] sm:$0xff] (!%p189_p2)   ;;  %v574_v52 = vld [vmem:[%s686_s1 + $0x18] sm:$0xff] (!%p189_p2)  }
   0x8   : > { %s235_s27 = scalar_lea.vmem (!%p189_p2), %s686_s1, %s523_s22  ;;  %550 = vmatprep.subr.bf16.mxu0 (!%p189_p2), %v571_v49 }
   0x9   : > { %v536_v1 = vld [vmem:[%s235_s27] sm:$0xff] (!%p189_p2)   ;;  %v543_v2 = vld [vmem:[%s235_s27 + $0x8] sm:$0xff] (!%p189_p2)   ;;  %551 = vmatpush3.bf16.msra.mxu0 (!%p189_p2), %v571_v49 }
   0xa   : > { %v537_v3 = vunpack.c.l.bf16 (!%p189_p2), %v536_v1  ;;  %v541_v4 = vunpack.c.l.bf16 (!%p189_p2), %v543_v2  ;;  %v538_v5 = vunpack.c.h.bf16 (!%p189_p2), %v536_v1  ;;  %v542_v6 = vunpack.c.h.bf16 (!%p189_p2), %v543_v2  ;;  %552 = vmatprep.subr.bf16.mxu0 (!%p189_p2), %v572_v50 }
   0xc   : > { %v251_v7 = vmul.f32 (!%p189_p2), %v537_v3, %v524_v0  ;;  %v253_v8 = vmul.f32 (!%p189_p2), %v541_v4, %v524_v0  ;;  %v252_v9 = vmul.f32 (!%p189_p2), %v538_v5, %v524_v0  ;;  %v254_v10 = vmul.f32 (!%p189_p2), %v542_v6, %v524_v0 }
   0xd   : > { %s692_s28 = smov (!%p217_p3, %s518_s28), 7  ;;  %553 = vmatpush3.bf16.msra.mxu0 %v572_v50 }
   0xe   : > { %255 = vadd.xlane.f32.xlu0 %v251_v7  ;;  %259 = vadd.xlane.f32.xlu1 %v253_v8  ;;  %s519_s29 = sshll.u32 %s692_s28, 1  ;;  %s521_s19 = sshll.u32 %s692_s28, 3 }
   0xf   : > { %s220_s7 = scalar_lea.vmem %s685_s0, %s519_s29  ;;  %554 = vmatprep.subr.bf16.mxu0 %v573_v51  ;;  %s226_s24 = scalar_lea.vmem %s690_s5, %s521_s19 }
  0x10   : > { %v282_v11 = vld [vmem:[%s220_s7] sm:$0x3]  ;;  %v284_v12 = vld [vmem:[%s220_s7 + $0x4] sm:$0x3]  ;;  %v283_v13 = vld [vmem:[%s220_s7 + $0x2] sm:$0x3] }
  0x11   : > { %vm286_vm0 = vnez %v282_v11  ;;  %vm288_vm1 = vnez %v284_v12  ;;  %v285_v16 = vld [vmem:[%s220_s7 + $0x6] sm:$0x3]  ;;  %vm287_vm2 = vnez %v283_v13  ;;  %555 = vmatpush3.bf16.msra.mxu0 %v573_v51 }
  0x12   : > { %257 = vadd.xlane.f32.xlu0 %v252_v9  ;;  %261 = vadd.xlane.f32.xlu1 %v254_v10  ;;  %v290_v15 = vsel %vm286_vm0, 16843009, %v599_v14  ;;  %v292_v18 = vsel %vm288_vm1, 16843009, %v599_v14  ;;  %vm289_vm3 = vnez %v285_v16  ;;  %v291_v24 = vsel %vm287_vm2, 16843009, %v599_v14 }
  0x13   : > { %v294_v21 = vunpack.c.0.s8 %v290_v15  ;;  %v296_v25 = vunpack.c.0.s8 %v292_v18  ;;  %v293_v28 = vsel %vm289_vm3, 16843009, %v599_v14  ;;  %v295_v31 = vunpack.c.0.s8 %v291_v24  ;;  %556 = vmatprep.subr.bf16.mxu0 %v574_v52  ;;  %v532_v18 = vld [vmem:[%s689_s4] ss:$0 sm:$0xff] }
  0x14   : > { %v297_v36 = vunpack.c.0.s8 %v293_v28 }
  0x15   : > { %vm298_vm4 = vcmp.ne.s32.totalorder %v294_v21, 0  ;;  %vm300_vm6 = vcmp.ne.s32.totalorder %v296_v25, 0  ;;  %vm299_vm7 = vcmp.ne.s32.totalorder %v295_v31, 0  ;;  %557 = vmatpush3.bf16.msra.mxu0 %v574_v52 }
  0x16   : > { %vm301_vm8 = vcmp.ne.s32.totalorder %v297_v36, 0 }
  0x9b   : > { %v256_v19 = vpop.xlane.xlu0 %255  ;;  %v260_v20 = vpop.xlane.xlu1 %259 }
  0x9c   : > { %v270_v22 = vadd.f32 %v525_v17, %v256_v19  ;;  %v272_v23 = vadd.f32 %v525_v17, %v260_v20 }
  0x9e   : > { %v274_v26 = vmul.f32 0.2, %v270_v22  ;;  %v276_v27 = vmul.f32 0.2, %v272_v23 }
  0x9f   : > { %v258_v29 = vpop.xlane.xlu0 %257  ;;  %v262_v30 = vpop.xlane.xlu1 %261 }
  0xa0   : > { %v278_v32 = vmax.f32 %v270_v22, %v274_v26  ;;  %v280_v33 = vmax.f32 %v272_v23, %v276_v27  ;;  %v271_v34 = vadd.f32 %v525_v17, %v258_v29  ;;  %v273_v35 = vadd.f32 %v525_v17, %v262_v30 }
  0xa2   : > { %v275_v37 = vmul.f32 0.2, %v271_v34  ;;  %v277_v38 = vmul.f32 0.2, %v273_v35  ;;  %v302_v39 = vsel %vm298_vm4, %v278_v32, -1e+30 }
  0xa3   : > { %v307_v40 = vsel %vm306_vm5, %v302_v39, -inf  ;;  %v304_v43 = vsel %vm300_vm6, %v280_v33, -1e+30 }
  0xa4   : > { %v279_v41 = vmax.f32 %v271_v34, %v275_v37  ;;  %v281_v42 = vmax.f32 %v273_v35, %v277_v38  ;;  %308 = vmax.xlane.f32.xlu0 %v307_v40  ;;  %v313_v46 = vsel %vm306_vm5, %v304_v43, -inf }
  0xa6   : > { %v303_v44 = vsel %vm299_vm7, %v279_v41, -1e+30  ;;  %v305_v47 = vsel %vm301_vm8, %v281_v42, -1e+30 }
  0xa7   : > { %v310_v45 = vsel %vm306_vm5, %v303_v44, -inf  ;;  %v316_v48 = vsel %vm306_vm5, %v305_v47, -inf }
  0xa8   : > { %311 = vmax.xlane.f32.xlu1 %v310_v45  ;;  %314 = vmax.xlane.f32.xlu0 %v313_v46 }
  0xac   : > { %317 = vmax.xlane.f32.xlu1 %v316_v48 }
 0x131   : > { %v309_v53 = vpop.xlane.xlu0 %308 }
 0x132   : > { %v319_v54 = vsub.f32 %v302_v39, %v309_v53 }
 0x134   : > { %v323_v55 = vmul.f32 1.442695, %v319_v54 }
 0x135   : > { %v312_v56 = vpop.xlane.xlu1 %311  ;;  %v315_v57 = vpop.xlane.xlu0 %314 }
 0x136   : > { %575 = vpow2.f32 %v323_v55  ;;  %v320_v58 = vsub.f32 %v303_v44, %v312_v56  ;;  %v321_v59 = vsub.f32 %v304_v43, %v315_v57 }
 0x138   : > { %v325_v60 = vmul.f32 1.442695, %v320_v58  ;;  %v327_v61 = vmul.f32 1.442695, %v321_v59 }
 0x139   : > { %v318_v62 = vpop.xlane.xlu1 %317 }
 0x13a   : > { %577 = vpow2.f32 %v325_v60  ;;  %v322_v63 = vsub.f32 %v305_v47, %v318_v62 }
 0x13b   : > { %579 = vpow2.f32 %v327_v61 }
 0x13c   : > { %v329_v0 = vmul.f32 1.442695, %v322_v63 }
 0x13e   : > { %581 = vpow2.f32 %v329_v0 }
 0x140   : > { %v576_v1 = vpop.eup %575 }
 0x141   : > { %v331_v2 = vsel %vm306_vm5, %v576_v1, 0.0 }
 0x142   : > { %332 = vadd.xlane.f32.xlu0 %v331_v2 }
 0x144   : > { %v578_v3 = vpop.eup %577 }
 0x145   : > { %v580_v4 = vpop.eup %579  ;;  %v334_v5 = vsel %vm306_vm5, %v578_v3, 0.0  ;;  %v343_v6 = vpack.c.bf16 %v578_v3, %v576_v1 }
 0x146   : > { %335 = vadd.xlane.f32.xlu1 %v334_v5  ;;  %v337_v7 = vsel %vm306_vm5, %v580_v4, 0.0 }
 0x147   : > { %338 = vadd.xlane.f32.xlu0 %v337_v7  ;;  %558 = vmatprep.mubr.msk.bf16.mxu0 %vm306_vm5, %v343_v6 }
 0x148   : > { %v582_v8 = vpop.eup %581 }
 0x149   : > { %v340_v9 = vsel %vm306_vm5, %v582_v8, 0.0  ;;  %v344_v10 = vpack.c.bf16 %v582_v8, %v580_v4 }
 0x14a   : > { %341 = vadd.xlane.f32.xlu1 %v340_v9 }
 0x14b   : > { %559 = vmatmul.mubr.msk.bf16.vlgmr.msra.gmra.mrb[0].mxu0 %vm306_vm5, %v344_v10 }
 0x1cf   : > { %v333_v11 = vpop.xlane.xlu0 %332 }
 0x1d0   : > { %583 = vrcp.f32 %v333_v11 }
 0x1d3   : > { %v336_v12 = vpop.xlane.xlu1 %335 }
 0x1d4   : > { %v339_v13 = vpop.xlane.xlu0 %338  ;;  %585 = vrcp.f32 %v336_v12 }
 0x1d5   : > { %587 = vrcp.f32 %v339_v13 }
 0x1d7   : > { %v342_v14 = vpop.xlane.xlu1 %341 }
 0x1d8   : > { %589 = vrcp.f32 %v342_v14 }
 0x1da   : > { %v584_v15 = vpop.eup %583 }
 0x1de   : > { %v586_v17 = vpop.eup %585 }
 0x1df   : > { %v588_v20 = vpop.eup %587 }
 0x1e2   : > { %v590_v23 = vpop.eup %589 }
 0x21e   : > { %v560_v16 = vpop.f32.mrb[0].mxu0 }
 0x21f   : > { %v417_v19 = vpop.f32.mrb[1].mxu0  ;;  %v438_v24 = vmul.f32 %v588_v20, %v560_v16 }
 0x220   : > { %v436_v21 = vmul.f32 %v584_v15, %v417_v19  ;;  %v561_v22 = vpop.f32.mrb[2].mxu0 }
 0x221   : > { %v420_v25 = vpop.f32.mrb[3].mxu0  ;;  %v439_v27 = vmul.f32 %v590_v23, %v561_v22  ;;  %v449_v30 = vadd.f32 %v532_v18, %v438_v24 }
 0x222   : > { %v447_v26 = vadd.f32 %v532_v18, %v436_v21  ;;  %v437_v28 = vmul.f32 %v586_v17, %v420_v25 }
 0x223   : > { %v450_v31 = vadd.f32 %v532_v18, %v439_v27  ;;  %453 = vst [vmem:[%s226_s24 + $0x10] sm:$0xff] %v449_v30 }
 0x224   : > { %451 = vst [vmem:[%s226_s24] sm:$0xff] %v447_v26  ;;  %v448_v29 = vadd.f32 %v532_v18, %v437_v28 }
 0x225   : > { %454 = vst [vmem:[%s226_s24 + $0x18] sm:$0xff] %v450_v31 }
 0x226   : > { %452 = vst [vmem:[%s226_s24 + $0x8] sm:$0xff] %v448_v29 }
 0x227 PF: > { %s15_s18 = sadd.s32 1, %s597_s18  }
 0x228   : > { %p12_p4 = scmp.ge.s32.totalorder %s15_s18, 4  }
 0x22a   :  { %14 = sbr.rel (!%p12_p4) target bundleno = 1 (0x1), region = 71 }

</bundles_post_ra>
